<compile_context>
chip_gen: v7x
topology: tpu7x:2x2x1
jax: 0.10.0
libtpu: 0.0.40
codegen_flags: <defaults>
</compile_context>

<pallas_src>
import numpy as np
import jax
import jax.numpy as jnp
from jax.experimental import pallas as pl
from jax.experimental.pallas import tpu as pltpu

PI = np.float32(np.pi)
TWO_PI = np.float32(2.0 * np.pi)
INV_TWO_PI = np.float32(1.0 / (2.0 * np.pi))

_LANE = 128
_SUBLANE = 8
_TILE_BUDGET_BYTES = 8 * 1024 * 1024    # per-tile footprint target (f32)
_VMEM_LIMIT_BYTES = 48 * 1024 * 1024    # 2x(in)+2x(out) ~32 MiB + slack; safe on v5e/v6e/v7x
_MEGACORE_MIN_BYTES = 2 * 1024 * 1024   # only force >=2 grid steps when worth it


def _phase_shift_kernel(shift_ref, x_ref, o_ref):
    # shift_ref: (tb, 1)  f32 -- per-batch phase_shift / (2*pi)
    # x_ref/o_ref: (tb, tw) f32 flattened spatial tile
    z = x_ref[...] + shift_ref[...]          # per-row scalar broadcast along lanes
    # mod(x + s/(2*pi), 1.0).  Can round to exactly 1.0 at a 1-ULP boundary,
    # matching torch.remainder's own edge behaviour within test tolerance.
    o_ref[...] = z - jnp.floor(z)


def _round_up(x, m):
    return ((x + m - 1) // m) * m


def _round_down(x, m):
    return (x // m) * m


def _choose_tiles(B, HW, elem_bytes):
    # Sublane (batch) tile: multiple of 8, or the full (small) batch dim.
    if B <= _SUBLANE:
        tb = B
    else:
        tb = min(128, _round_down(B, _SUBLANE))

    # Lane tile: multiple of 128 (or the full, small HW dim), sized so one
    # tile fits the byte budget.  cdiv grid handles a padded/masked last block.
    if HW <= _LANE:
        tw = HW
    else:
        cap = max(_LANE, _round_down(_TILE_BUDGET_BYTES // (tb * elem_bytes), _LANE))
        tw = min(_round_up(HW, _LANE), cap)

    # Megacore: for large problems keep >= 2 grid steps along a parallel axis
    # so both v7x TensorCores get work (2x aggregate HBM bandwidth).
    total_bytes = B * HW * elem_bytes
    if (pl.cdiv(B, tb) * pl.cdiv(HW, tw) < 2
            and total_bytes >= _MEGACORE_MIN_BYTES
            and HW > _LANE and tw > _LANE):
        half = max(_LANE, _round_down(tw // 2, _LANE))
        if pl.cdiv(HW, half) >= 2:
            tw = half
    return tb, tw


def random_phase_shift(x, phase_shifts, *, donate_x=False):
    """x: (B, H, W) f32, phase_shifts: (B,) f32 -> (B, H, W) f32."""
    B, H, W = x.shape
    HW = H * W
    x2d = x.reshape(B, HW)                                    # lane-dense last axis
    shifts2d = (phase_shifts.astype(jnp.float32) * INV_TWO_PI).reshape(B, 1)

    elem_bytes = jnp.dtype(x2d.dtype).itemsize
    tb, tw = _choose_tiles(B, HW, elem_bytes)
    grid_b = pl.cdiv(B, tb)
    grid_w = pl.cdiv(HW, tw)

    # Put the axis with more blocks first so the leading parallel grid axis
    # has extent > 1 and can be sharded across TensorCores.
    if grid_w > grid_b:
        grid = (grid_w, grid_b)
        s_map = lambda j, i: (i, 0)
        x_map = lambda j, i: (i, j)
    else:
        grid = (grid_b, grid_w)
        s_map = lambda i, j: (i, 0)
        x_map = lambda i, j: (i, j)

    extra = {}
    if donate_x:
        # x2d is operand index 1 (after shifts2d); alias it with output 0.
        extra["input_output_aliases"] = {1: 0}

    out2d = pl.pallas_call(
        _phase_shift_kernel,
        out_shape=jax.ShapeDtypeStruct((B, HW), x.dtype),
        grid=grid,
        in_specs=[
            pl.BlockSpec((tb, 1), s_map),     # per-batch shifts (VMEM)
            pl.BlockSpec((tb, tw), x_map),    # x tile (VMEM)
        ],
        out_specs=pl.BlockSpec((tb, tw), x_map),
        compiler_params=pltpu.CompilerParams(
            dimension_semantics=("parallel", "parallel"),
            vmem_limit_bytes=_VMEM_LIMIT_BYTES),
        **extra,
    )(shifts2d, x2d)
    return out2d.reshape(B, H, W)


def _reference(x, phase_shifts, apply_shift):
    # Faithful port of the PyTorch forward chain.
    xs = x * TWO_PI - PI
    shifted = xs + phase_shifts[:, None, None]
    wrapped = jnp.mod(shifted + PI, TWO_PI) - PI
    y = (wrapped + PI) / TWO_PI
    return jnp.where(apply_shift[:, None, None], y, y)


if __name__ == "__main__":
    B, H, W = 2, 16, 16
    key = jax.random.PRNGKey(0)
    kx, kshift, kapply = jax.random.split(key, 3)

    x = jax.random.uniform(kx, (B, H, W), dtype=jnp.float32)
    # module defaults: shift_range = (-pi, pi), p = 0.5
    phase_shifts = jax.random.uniform(
        kshift, (B,), dtype=jnp.float32, minval=-np.pi, maxval=np.pi)
    # Drawn to mirror the module's RNG; torch.where(mask, y, y) is a no-op,
    # so the mask is not passed to (or used by) the kernel.
    apply_shift = jax.random.uniform(kapply, (B,)) < 0.5

    out = jax.block_until_ready(random_phase_shift(x, phase_shifts))

    ref = _reference(x, phase_shifts, apply_shift)
    np.testing.assert_allclose(np.asarray(out), np.asarray(ref),
                               atol=1e-5, rtol=1e-5)

    print("KERNEL_OK")
</pallas_src>

<mosaic_0001>
module attributes {stable_mosaic.version = 11 : i64} {
  func.func @_phase_shift_kernel(%arg0: i32, %arg1: i32, %arg2: memref<2x1xf32, #tpu.memory_space<vmem>>, %arg3: memref<2x256xf32, #tpu.memory_space<vmem>>, %arg4: memref<2x256xf32, #tpu.memory_space<vmem>>) attributes {dimension_semantics = [#tpu.dimension_semantics<parallel>, #tpu.dimension_semantics<parallel>], iteration_bounds = array<i64: 1, 1>, scalar_prefetch = 0 : i64, scratch_operands = 0 : i64, tpu.core_type = #tpu.core_type<tc>, window_params = [{transform_indices = @transform_0, window_bounds = array<i64: 2, 1>}, {transform_indices = @transform_1, window_bounds = array<i64: 2, 256>}, {transform_indices = @transform_2, window_bounds = array<i64: 2, 256>}]} {
    %c0 = arith.constant 0 : index
    %c0_0 = arith.constant 0 : index
    %0 = vector.load %arg3[%c0, %c0_0] : memref<2x256xf32, #tpu.memory_space<vmem>>, vector<2x256xf32>
    %c0_1 = arith.constant 0 : index
    %c0_2 = arith.constant 0 : index
    %1 = vector.load %arg2[%c0_1, %c0_2] : memref<2x1xf32, #tpu.memory_space<vmem>>, vector<2x1xf32>
    %2 = vector.broadcast %1 : vector<2x1xf32> to vector<2x256xf32>
    %3 = arith.addf %0, %2 : vector<2x256xf32>
    %4 = math.floor %3 : vector<2x256xf32>
    %5 = arith.subf %3, %4 : vector<2x256xf32>
    %c0_3 = arith.constant 0 : index
    %c0_4 = arith.constant 0 : index
    %6 = vector.load %arg4[%c0_3, %c0_4] : memref<2x256xf32, #tpu.memory_space<vmem>>, vector<2x256xf32>
    tpu.vector_store %arg4[%c0_3, %c0_4], %5 {strides = array<i32>} : memref<2x256xf32, #tpu.memory_space<vmem>>, vector<2x256xf32>,
    return
  }
  func.func @transform_0(%arg0: i32, %arg1: i32) -> (i32, i32) {
    %c0_i32 = arith.constant 0 : i32
    %c0_i32_0 = arith.constant 0 : i32
    return %arg0, %c0_i32 : i32, i32
  }
  func.func @transform_1(%arg0: i32, %arg1: i32) -> (i32, i32) {
    %c0_i32 = arith.constant 0 : i32
    return %arg0, %arg1 : i32, i32
  }
  func.func @transform_2(%arg0: i32, %arg1: i32) -> (i32, i32) {
    %c0_i32 = arith.constant 0 : i32
    return %arg0, %arg1 : i32, i32
  }
}

</mosaic_0001>

<bundles_post_ra>
// kernel: tpu_custom_call.1
= control target key start
LH: loop header
LB: loop body
LE: loop exit
PB: predicated region body
PF: predicated region fallthrough
CT: control target
= control target key end

     0   :  { %v72_v1 = vmov 0   ;;  %s108_s0 = inlined_call_operand.vmem [shape: f32[2,1], index: 0, kind: input, shape index: {}]   ;;  %s109_s1 = inlined_call_operand.vmem [shape: f32[2,256], index: 1, kind: input, shape index: {}]   ;;  %s110_s2 = inlined_call_operand.hbm [shape: f32[2,256], index: 2, kind: output, shape index: {}]  }
   0x1   :  { %v13_v0 = vld [vmem:[%s108_s0] sm:$0x3]  ;;  %47 = vset.pattern.permute.xlu0 %v72_v1 }
   0x2   :  { %7 = vsyncpa [#allocation3], 0  ;;  %16 = vperm.xlu0 %47, %v13_v0   ;;  %v73_v2 = vmov 269488144   ;;  %v21_v4 = vlaneseq  ;;  %v12_v9 = vld [vmem:[%s109_s1] sm:$0xf] }
   0x3   :  { %v19_v3 = vunpack.c.l.s4 %v73_v2  ;;  %s74_s13 = smov [#allocation2]  }
   0x4   :  { %v22_v6 = vshrl.u32 %v21_v4, 7  ;;  %s36_s14 = sshll.u32 %s74_s13, 4  ;;  %s37_s14 = int_to_ptr.vmem [resolvable:$true] %s36_s14 }
   0x5   :  { %v20_v5 = vunpack.c.0.s8 %v19_v3  ;;  %s48_s0 = scalar_lea.vmem %s37_s14, 64  ;;  %p53_p1 = scmp.lt.s32.totalorder %s37_s14, %s37_s14 }
   0x6   :  { %p49_p0 = scmp.ne.s32.totalorder %s37_s14, %s48_s0  ;;  %p54_p2 = scmp.lt.s32.totalorder %s48_s0, %s48_s0 }
   0x7   :  { %v23_v7 = vsub.s32 %v20_v5, %v22_v6 }
   0x8   :  { %p55_p3 = por %p54_p2, %p53_p1 }
   0xa   :  { %p56_p4 = pnand %p55_p3, %p49_p0 }
  0x81   :  { %v17_v8 = vpop.permute.xlu0 %16 }
  0x82   :  { %v24_v10 = vrot.slane %v17_v8, %v23_v7 }
  0x84   :  { %v26_v11 = vadd.f32 %v24_v10, %v12_v9 }
  0x86   :  { %v27_v12 = vfloor.f32 %v26_v11 }
  0x88   :  { %v28_v13 = vsub.f32 %v26_v11, %v27_v12 }
  0x8a   :  { %29 = vst [vmem:[#allocation2] sm:$0xf] %v28_v13 }
  0x8b   :  { %59 = shalt.err (!%p56_p4)
}
  0x8c   :  { %s60_s17 = scalar_lea.hbm %s110_s2, 64 }
  0x8d   :  { %p61_p5 = scmp.ne.s32.totalorder %s110_s2, %s60_s17  ;;  %p64_p6 = scmp.lt.u32.totalorder %s60_s17, %s110_s2 }
  0x8f   :  { %p66_p7 = pnand %p64_p6, %p61_p5 }
  0x91   :  { %69 = shalt.err (!%p66_p7)
}
  0x92   :  { %39 = dma.vmem_to_hbm [thread:$0]  %s37_s14, 64, %s110_s2, [#allocation3]  }
  0x93   :  { %70 = dma.done.wait [#allocation3], 64  }
  0x94   :  { %71 = vsyncadd [#allocation3], 4294967232 }
  0x95   :  { %43 = vsyncpa [#allocation3], 1 }

</bundles_post_ra>
